<compile_context>
chip_gen: v5e
topology: v5e:2x2
jax: 0.10.0
libtpu: 0.0.40
codegen_flags: <defaults>
</compile_context>

<pallas_src>
import functools

import jax
import jax.numpy as jnp
import numpy as np
from jax.experimental import pallas as pl
from jax.experimental.pallas import tpu as pltpu

_SLOT = 8  # rows per packed-parameter slot == padded channel count (<= 8 chans)


def _elu(x):
    # F.elu, alpha=1.0.  exp() of the (discarded) positive branch may overflow
    # to +inf on TPU; it is never selected and there are no FP traps, so no
    # clamp is needed.
    return jnp.where(x > 0, x, jnp.exp(x) - 1.0)


def _bottleneck_kernel(x_ref, p_ref, c_ref, o_ref, *, H, W, c_out):
    """One grid step = a block of whole images flattened onto the lane axis.

    x_ref : (8, L)      channel-major input (channels padded to 8), L = n_blk*H*W
    p_ref : (64, 72)    packed parameter table (layout built in the wrapper)
    c_ref : (2, L)      row 0 = y coordinate, row 1 = x coordinate (f32), per image
    o_ref : (Co, L)
    """
    S = _SLOT
    L = x_ref.shape[1]

    # ---- unpack the packed parameter table (all static, slot-aligned slices) ----
    w1 = p_ref[0:S, 0:S]                  # conv1 wt (bn1 scale folded), padded
    w2 = p_ref[S:2 * S, 0:9 * S]          # conv2: 9 taps side by side (bn2 folded)
    w34 = p_ref[2 * S:3 * S, 0:2 * S]     # [conv3 | conv_skip] fused weight
    s0 = p_ref[3 * S:4 * S, 0:1]          # bn0 scale
    sh0 = p_ref[4 * S:5 * S, 0:1]         # bn0 shift
    sh1 = p_ref[5 * S:6 * S, 0:1]         # bn1 shift
    sh2 = p_ref[6 * S:7 * S, 0:1]         # bn2 shift
    bout = p_ref[7 * S:8 * S, 0:1]        # conv3 bias + conv_skip bias

    x = x_ref[...]                        # (8, L) f32, pad rows are zero

    # pre-activation branch -> feeds only the skip projection
    x_in = _elu(x * s0 + sh0)

    # conv1 (1x1, no bias, bn1 scale folded) on the RAW input
    h1 = _elu(jnp.dot(w1, x, preferred_element_type=jnp.float32) + sh1)

    # conv2: 3x3 'same' as ONE MXU dot over a stacked (72, L) operand.
    # Off-centre taps are XLU lane-rolls + per-pixel boundary masks; masks also
    # zero any cross-image / wraparound spill, matching zero padding exactly.
    yy = c_ref[0:1, :]
    xx = c_ref[1:2, :]
    taps = []
    for t in range(9):
        dy, dx = t // 3 - 1, t % 3 - 1
        if dy == 0 and dx == 0:
            taps.append(h1)
            continue
        off = dy * W + dx                            # want shifted[p] = h1[p + off]
        src = pltpu.roll(h1, shift=(-off) % L, axis=1)
        m = None
        if dy != 0:
            m = (yy >= 1) if dy < 0 else (yy <= H - 2)
        if dx != 0:
            mx = (xx >= 1) if dx < 0 else (xx <= W - 2)
            m = mx if m is None else jnp.logical_and(m, mx)
        taps.append(jnp.where(m, src, 0.0))
    stacked = jnp.concatenate(taps, axis=0)          # (9*8, L), slot-aligned concat
    h2 = _elu(jnp.dot(w2, stacked, preferred_element_type=jnp.float32) + sh2)

    # conv3 + conv_skip fused into a single dot; biases pre-summed host-side.
    cat = jnp.concatenate([h2, x_in], axis=0)        # (16, L)
    out = jnp.dot(w34, cat, preferred_element_type=jnp.float32) + bout
    o_ref[...] = out[:c_out, :].astype(o_ref.dtype)


def _pick_images_per_block(n_imgs, hw, c_in, c_out, budget_bytes=8 << 20):
    """Largest whole-image block per grid step that keeps VMEM blocks modest
    (well under every generation's scoped-VMEM default) and lane-legal."""
    per_img = (c_in + c_out) * hw * 4 * 2            # double-buffered in + out
    n_blk = max(1, min(n_imgs, budget_bytes // per_img))
    while n_blk > 1 and (n_imgs % n_blk != 0 or (n_blk * hw) % 128 != 0):
        n_blk -= 1
    if (n_blk * hw) % 128 != 0 and n_blk != n_imgs:
        n_blk = n_imgs                               # single full-axis block
    return n_blk


def bottleneck_pallas(x_nchw, params):
    (s0, sh0, w1, s1, sh1, w2, s2, sh2, w3, b3, wsk, bsk) = params
    N, Cp, H, W = x_nchw.shape
    Cm = w1.shape[0]
    Co = w3.shape[0]
    HW = H * W
    S = _SLOT
    assert max(Cp, Cm, Co) <= S, "packed-table layout assumes <= 8 channels"
    assert wsk.shape[1] == Cp, "conv_skip needs prevfeatures == infeatures"

    # ---- fold BN scales into the bias-free conv1 / conv2 weights (exact in
    #      eval mode), fuse conv3 + conv_skip, pack everything into ONE table ----
    w1f = w1[:, :, 0, 0] * s1[:, None]                                # (Cm, Cp)
    w2f = (jnp.transpose(w2, (2, 3, 0, 1)).reshape(9, Cm, Cm)
           * s2[None, :, None])                                       # (tap, out, in)
    b_out = b3 + bsk                                                  # (Co,)

    ncols = 9 * S
    ptab = jnp.zeros((8 * S, ncols), jnp.float32)
    ptab = ptab.at[0:Cm, 0:Cp].set(w1f)                               # slot 0: conv1
    for t in range(9):                                                # slot 1: conv2 taps
        ptab = ptab.at[S:S + Cm, t * S:t * S + Cm].set(w2f[t])
    ptab = ptab.at[2 * S:2 * S + Co, 0:Cm].set(w3[:, :, 0, 0])        # slot 2: conv3 |
    ptab = ptab.at[2 * S:2 * S + Co, S:S + Cp].set(wsk[:, :, 0, 0])   #         conv_skip
    for i, v in enumerate((s0, sh0, sh1, sh2, b_out)):                # slots 3..7: vectors
        r = (3 + i) * S
        ptab = ptab.at[r:r + v.shape[0], 0].set(v)

    # ---- batch flattened onto the lane axis, channels padded to one slot ----
    x2 = jnp.transpose(x_nchw, (1, 0, 2, 3)).reshape(Cp, N * HW)
    if Cp < S:
        x2 = jnp.pad(x2, ((0, S - Cp), (0, 0)))

    # ---- grid over whole-image blocks of the lane axis (megacore 'parallel');
    #      at the tested size this is a single grid step ----
    n_blk = _pick_images_per_block(N, HW, S, Co)
    nb = N // n_blk
    L = n_blk * HW

    # per-image spatial coordinates along the lane axis (host-side constants;
    # avoids vector integer div/rem inside the kernel), tiled per block
    pos = np.arange(HW)
    coord_img = np.stack([pos // W, pos % W]).astype(np.float32)      # (2, HW)
    coords = jnp.asarray(np.tile(coord_img, (1, n_blk)))              # (2, L)

    kernel = functools.partial(_bottleneck_kernel, H=H, W=W, c_out=Co)
    out_flat = pl.pallas_call(
        kernel,
        out_shape=jax.ShapeDtypeStruct((Co, N * HW), jnp.float32),
        grid=(nb,),
        in_specs=[
            pl.BlockSpec((S, L), lambda i: (0, i)),
            pl.BlockSpec(ptab.shape, lambda i: (0, 0)),
            pl.BlockSpec(coords.shape, lambda i: (0, 0)),
        ],
        out_specs=pl.BlockSpec((Co, L), lambda i: (0, i)),
        compiler_params=pltpu.CompilerParams(
            dimension_semantics=("parallel",)),
    )(x2, ptab, coords)

    # TODO(synk): for very large batches, raise vmem_limit_bytes (v5e/v6e) or
    # shrink the per-step image block further for v7x's 64 MiB VMEM.
    return out_flat.reshape(Co, N, H, W).transpose(1, 0, 2, 3)


def bottleneck_reference(x, params):
    """Pure-JAX NCHW reference mirroring the PyTorch forward (unfolded params)."""
    (s0, sh0, w1, s1, sh1, w2, s2, sh2, w3, b3, wsk, bsk) = params
    N, Cp, H, W = x.shape

    def bn(v, s, sh):
        return v * s[None, :, None, None] + sh[None, :, None, None]

    x_in = _elu(bn(x, s0, sh0))
    h1 = _elu(bn(jnp.einsum('nchw,dc->ndhw', x, w1[:, :, 0, 0]), s1, sh1))
    hp = jnp.pad(h1, ((0, 0), (0, 0), (1, 1), (1, 1)))
    h2 = jnp.zeros_like(h1)
    for ky in range(3):
        for kx in range(3):
            h2 = h2 + jnp.einsum('nchw,dc->ndhw',
                                 hp[:, :, ky:ky + H, kx:kx + W], w2[:, :, ky, kx])
    h2 = _elu(bn(h2, s2, sh2))
    h3 = jnp.einsum('nchw,dc->ndhw', h2, w3[:, :, 0, 0]) + b3[None, :, None, None]
    skip = (jnp.einsum('nchw,dc->ndhw', x_in, wsk[:, :, 0, 0])
            + bsk[None, :, None, None])
    return h3 + skip


def _bn_scale_shift(key, c, eps=1e-3):
    k1, k2, k3, k4 = jax.random.split(key, 4)
    gamma = jax.random.uniform(k1, (c,), jnp.float32, 0.5, 1.5)
    beta = 0.1 * jax.random.normal(k2, (c,), jnp.float32)
    mean = 0.1 * jax.random.normal(k3, (c,), jnp.float32)
    var = jax.random.uniform(k4, (c,), jnp.float32, 0.5, 1.5)
    scale = gamma / jnp.sqrt(var + eps)
    shift = beta - mean * scale
    return scale, shift


if __name__ == "__main__":
    key = jax.random.PRNGKey(0)
    N, H, W = 2, 16, 16
    Cprev, Cmid, Cout = 4, 4, 8      # prevfeatures=infeatures=4, outfeatures=8

    ks = jax.random.split(key, 10)
    x = jax.random.normal(ks[0], (N, Cprev, H, W), jnp.float32)

    # BatchNorm (eval-mode) folded per-channel parameters.
    s0, sh0 = _bn_scale_shift(ks[1], Cprev)
    s1, sh1 = _bn_scale_shift(ks[2], Cmid)
    s2, sh2 = _bn_scale_shift(ks[3], Cmid)

    # Conv weights in PyTorch (out, in, kh, kw) layout.
    w1 = 0.3 * jax.random.normal(ks[4], (Cmid, Cprev, 1, 1), jnp.float32)
    w2 = 0.2 * jax.random.normal(ks[5], (Cmid, Cmid, 3, 3), jnp.float32)
    w3 = 0.3 * jax.random.normal(ks[6], (Cout, Cmid, 1, 1), jnp.float32)
    b3 = 0.05 * jax.random.normal(ks[7], (Cout,), jnp.float32)
    wsk = 0.3 * jax.random.normal(ks[8], (Cout, Cprev, 1, 1), jnp.float32)
    bsk = 0.05 * jax.random.normal(ks[9], (Cout,), jnp.float32)

    params = (s0, sh0, w1, s1, sh1, w2, s2, sh2, w3, b3, wsk, bsk)

    out = jax.block_until_ready(bottleneck_pallas(x, params))
    ref = jax.block_until_ready(bottleneck_reference(x, params))

    assert out.shape == (N, Cout, H, W), out.shape
    np.testing.assert_allclose(np.asarray(out), np.asarray(ref),
                               rtol=1e-4, atol=1e-4)
    print("KERNEL_OK")
</pallas_src>

<mosaic_0001>
module attributes {stable_mosaic.version = 11 : i64} {
  func.func @_bottleneck_kernel(%arg0: i32, %arg1: memref<8x512xf32, #tpu.memory_space<vmem>>, %arg2: memref<64x72xf32, #tpu.memory_space<vmem>>, %arg3: memref<2x512xf32, #tpu.memory_space<vmem>>, %arg4: memref<8x512xf32, #tpu.memory_space<vmem>>) attributes {dimension_semantics = [#tpu.dimension_semantics<parallel>], iteration_bounds = array<i64: 1>, scalar_prefetch = 0 : i64, scratch_operands = 0 : i64, tpu.core_type = #tpu.core_type<tc>, window_params = [{transform_indices = @transform_0, window_bounds = array<i64: 8, 512>}, {pipeline_mode = #tpu.pipeline_mode<synchronous>, transform_indices = @transform_1, window_bounds = array<i64: 64, 72>}, {pipeline_mode = #tpu.pipeline_mode<synchronous>, transform_indices = @transform_2, window_bounds = array<i64: 2, 512>}, {transform_indices = @transform_3, window_bounds = array<i64: 8, 512>}]} {
    %c0 = arith.constant 0 : index
    %c0_0 = arith.constant 0 : index
    %0 = vector.load %arg2[%c0, %c0_0] : memref<64x72xf32, #tpu.memory_space<vmem>>, vector<8x8xf32>
    %c8 = arith.constant 8 : index
    %c0_1 = arith.constant 0 : index
    %1 = vector.load %arg2[%c8, %c0_1] : memref<64x72xf32, #tpu.memory_space<vmem>>, vector<8x72xf32>
    %c16 = arith.constant 16 : index
    %c0_2 = arith.constant 0 : index
    %2 = vector.load %arg2[%c16, %c0_2] : memref<64x72xf32, #tpu.memory_space<vmem>>, vector<8x16xf32>
    %c24 = arith.constant 24 : index
    %c0_3 = arith.constant 0 : index
    %3 = vector.load %arg2[%c24, %c0_3] : memref<64x72xf32, #tpu.memory_space<vmem>>, vector<8x1xf32>
    %c32 = arith.constant 32 : index
    %c0_4 = arith.constant 0 : index
    %4 = vector.load %arg2[%c32, %c0_4] : memref<64x72xf32, #tpu.memory_space<vmem>>, vector<8x1xf32>
    %c40 = arith.constant 40 : index
    %c0_5 = arith.constant 0 : index
    %5 = vector.load %arg2[%c40, %c0_5] : memref<64x72xf32, #tpu.memory_space<vmem>>, vector<8x1xf32>
    %c48 = arith.constant 48 : index
    %c0_6 = arith.constant 0 : index
    %6 = vector.load %arg2[%c48, %c0_6] : memref<64x72xf32, #tpu.memory_space<vmem>>, vector<8x1xf32>
    %c56 = arith.constant 56 : index
    %c0_7 = arith.constant 0 : index
    %7 = vector.load %arg2[%c56, %c0_7] : memref<64x72xf32, #tpu.memory_space<vmem>>, vector<8x1xf32>
    %c0_8 = arith.constant 0 : index
    %c0_9 = arith.constant 0 : index
    %8 = vector.load %arg1[%c0_8, %c0_9] : memref<8x512xf32, #tpu.memory_space<vmem>>, vector<8x512xf32>
    %9 = vector.broadcast %3 : vector<8x1xf32> to vector<8x512xf32>
    %10 = arith.mulf %8, %9 : vector<8x512xf32>
    %11 = vector.broadcast %4 : vector<8x1xf32> to vector<8x512xf32>
    %12 = arith.addf %10, %11 : vector<8x512xf32>
    %cst = arith.constant 0.000000e+00 : f32
    %13 = vector.broadcast %cst : f32 to vector<8x512xf32>
    %14 = arith.cmpf ogt, %12, %13 : vector<8x512xf32>
    %15 = math.exp %12 : vector<8x512xf32>
    %cst_10 = arith.constant 1.000000e+00 : f32
    %16 = vector.broadcast %cst_10 : f32 to vector<8x512xf32>
    %17 = arith.subf %15, %16 : vector<8x512xf32>
    %18 = arith.select %14, %12, %17 : vector<8x512xi1>, vector<8x512xf32>
    %cst_11 = arith.constant dense<0.000000e+00> : vector<8x512xf32>
    %19 = tpu.matmul %0, %8, %cst_11 {dimension_numbers = #tpu.dot_dimension_numbers<[1], [0], [0], [1], [0, 0, 1, 1], [], []>} : vector<8x8xf32>, vector<8x512xf32>, vector<8x512xf32> -> vector<8x512xf32>
    %20 = vector.broadcast %5 : vector<8x1xf32> to vector<8x512xf32>
    %21 = arith.addf %19, %20 : vector<8x512xf32>
    %cst_12 = arith.constant 0.000000e+00 : f32
    %22 = vector.broadcast %cst_12 : f32 to vector<8x512xf32>
    %23 = arith.cmpf ogt, %21, %22 : vector<8x512xf32>
    %24 = math.exp %21 : vector<8x512xf32>
    %cst_13 = arith.constant 1.000000e+00 : f32
    %25 = vector.broadcast %cst_13 : f32 to vector<8x512xf32>
    %26 = arith.subf %24, %25 : vector<8x512xf32>
    %27 = arith.select %23, %21, %26 : vector<8x512xi1>, vector<8x512xf32>
    %c0_14 = arith.constant 0 : index
    %c0_15 = arith.constant 0 : index
    %28 = vector.load %arg3[%c0_14, %c0_15] : memref<2x512xf32, #tpu.memory_space<vmem>>, vector<1x512xf32>
    %c1 = arith.constant 1 : index
    %c0_16 = arith.constant 0 : index
    %29 = vector.load %arg3[%c1, %c0_16] : memref<2x512xf32, #tpu.memory_space<vmem>>, vector<1x512xf32>
    %c17_i32 = arith.constant 17 : i32
    %30 = tpu.dynamic_rotate %27 by %c17_i32 dim 1 : vector<8x512xf32>, i32 -> vector<8x512xf32>
    %cst_17 = arith.constant 1.000000e+00 : f32
    %31 = vector.broadcast %cst_17 : f32 to vector<1x512xf32>
    %32 = arith.cmpf oge, %28, %31 : vector<1x512xf32>
    %cst_18 = arith.constant 1.000000e+00 : f32
    %33 = vector.broadcast %cst_18 : f32 to vector<1x512xf32>
    %34 = arith.cmpf oge, %29, %33 : vector<1x512xf32>
    %35 = arith.andi %32, %34 : vector<1x512xi1>
    %cst_19 = arith.constant 0.000000e+00 : f32
    %36 = vector.shape_cast %35 : vector<1x512xi1> to vector<1x512xi1>
    %37 = vector.broadcast %36 : vector<1x512xi1> to vector<8x512xi1>
    %38 = vector.broadcast %cst_19 : f32 to vector<8x512xf32>
    %39 = arith.select %37, %30, %38 : vector<8x512xi1>, vector<8x512xf32>
    %c16_i32 = arith.constant 16 : i32
    %40 = tpu.dynamic_rotate %27 by %c16_i32 dim 1 : vector<8x512xf32>, i32 -> vector<8x512xf32>
    %cst_20 = arith.constant 1.000000e+00 : f32
    %41 = vector.broadcast %cst_20 : f32 to vector<1x512xf32>
    %42 = arith.cmpf oge, %28, %41 : vector<1x512xf32>
    %cst_21 = arith.constant 0.000000e+00 : f32
    %43 = vector.shape_cast %42 : vector<1x512xi1> to vector<1x512xi1>
    %44 = vector.broadcast %43 : vector<1x512xi1> to vector<8x512xi1>
    %45 = vector.broadcast %cst_21 : f32 to vector<8x512xf32>
    %46 = arith.select %44, %40, %45 : vector<8x512xi1>, vector<8x512xf32>
    %c15_i32 = arith.constant 15 : i32
    %47 = tpu.dynamic_rotate %27 by %c15_i32 dim 1 : vector<8x512xf32>, i32 -> vector<8x512xf32>
    %cst_22 = arith.constant 1.000000e+00 : f32
    %48 = vector.broadcast %cst_22 : f32 to vector<1x512xf32>
    %49 = arith.cmpf oge, %28, %48 : vector<1x512xf32>
    %cst_23 = arith.constant 1.400000e+01 : f32
    %50 = vector.broadcast %cst_23 : f32 to vector<1x512xf32>
    %51 = arith.cmpf ole, %29, %50 : vector<1x512xf32>
    %52 = arith.andi %49, %51 : vector<1x512xi1>
    %cst_24 = arith.constant 0.000000e+00 : f32
    %53 = vector.shape_cast %52 : vector<1x512xi1> to vector<1x512xi1>
    %54 = vector.broadcast %53 : vector<1x512xi1> to vector<8x512xi1>
    %55 = vector.broadcast %cst_24 : f32 to vector<8x512xf32>
    %56 = arith.select %54, %47, %55 : vector<8x512xi1>, vector<8x512xf32>
    %c1_i32 = arith.constant 1 : i32
    %57 = tpu.dynamic_rotate %27 by %c1_i32 dim 1 : vector<8x512xf32>, i32 -> vector<8x512xf32>
    %cst_25 = arith.constant 1.000000e+00 : f32
    %58 = vector.broadcast %cst_25 : f32 to vector<1x512xf32>
    %59 = arith.cmpf oge, %29, %58 : vector<1x512xf32>
    %cst_26 = arith.constant 0.000000e+00 : f32
    %60 = vector.shape_cast %59 : vector<1x512xi1> to vector<1x512xi1>
    %61 = vector.broadcast %60 : vector<1x512xi1> to vector<8x512xi1>
    %62 = vector.broadcast %cst_26 : f32 to vector<8x512xf32>
    %63 = arith.select %61, %57, %62 : vector<8x512xi1>, vector<8x512xf32>
    %c511_i32 = arith.constant 511 : i32
    %64 = tpu.dynamic_rotate %27 by %c511_i32 dim 1 : vector<8x512xf32>, i32 -> vector<8x512xf32>
    %cst_27 = arith.constant 1.400000e+01 : f32
    %65 = vector.broadcast %cst_27 : f32 to vector<1x512xf32>
    %66 = arith.cmpf ole, %29, %65 : vector<1x512xf32>
    %cst_28 = arith.constant 0.000000e+00 : f32
    %67 = vector.shape_cast %66 : vector<1x512xi1> to vector<1x512xi1>
    %68 = vector.broadcast %67 : vector<1x512xi1> to vector<8x512xi1>
    %69 = vector.broadcast %cst_28 : f32 to vector<8x512xf32>
    %70 = arith.select %68, %64, %69 : vector<8x512xi1>, vector<8x512xf32>
    %c497_i32 = arith.constant 497 : i32
    %71 = tpu.dynamic_rotate %27 by %c497_i32 dim 1 : vector<8x512xf32>, i32 -> vector<8x512xf32>
    %cst_29 = arith.constant 1.400000e+01 : f32
    %72 = vector.broadcast %cst_29 : f32 to vector<1x512xf32>
    %73 = arith.cmpf ole, %28, %72 : vector<1x512xf32>
    %cst_30 = arith.constant 1.000000e+00 : f32
    %74 = vector.broadcast %cst_30 : f32 to vector<1x512xf32>
    %75 = arith.cmpf oge, %29, %74 : vector<1x512xf32>
    %76 = arith.andi %73, %75 : vector<1x512xi1>
    %cst_31 = arith.constant 0.000000e+00 : f32
    %77 = vector.shape_cast %76 : vector<1x512xi1> to vector<1x512xi1>
    %78 = vector.broadcast %77 : vector<1x512xi1> to vector<8x512xi1>
    %79 = vector.broadcast %cst_31 : f32 to vector<8x512xf32>
    %80 = arith.select %78, %71, %79 : vector<8x512xi1>, vector<8x512xf32>
    %c496_i32 = arith.constant 496 : i32
    %81 = tpu.dynamic_rotate %27 by %c496_i32 dim 1 : vector<8x512xf32>, i32 -> vector<8x512xf32>
    %cst_32 = arith.constant 1.400000e+01 : f32
    %82 = vector.broadcast %cst_32 : f32 to vector<1x512xf32>
    %83 = arith.cmpf ole, %28, %82 : vector<1x512xf32>
    %cst_33 = arith.constant 0.000000e+00 : f32
    %84 = vector.shape_cast %83 : vector<1x512xi1> to vector<1x512xi1>
    %85 = vector.broadcast %84 : vector<1x512xi1> to vector<8x512xi1>
    %86 = vector.broadcast %cst_33 : f32 to vector<8x512xf32>
    %87 = arith.select %85, %81, %86 : vector<8x512xi1>, vector<8x512xf32>
    %c495_i32 = arith.constant 495 : i32
    %88 = tpu.dynamic_rotate %27 by %c495_i32 dim 1 : vector<8x512xf32>, i32 -> vector<8x512xf32>
    %cst_34 = arith.constant 1.400000e+01 : f32
    %89 = vector.broadcast %cst_34 : f32 to vector<1x512xf32>
    %90 = arith.cmpf ole, %28, %89 : vector<1x512xf32>
    %cst_35 = arith.constant 1.400000e+01 : f32
    %91 = vector.broadcast %cst_35 : f32 to vector<1x512xf32>
    %92 = arith.cmpf ole, %29, %91 : vector<1x512xf32>
    %93 = arith.andi %90, %92 : vector<1x512xi1>
    %cst_36 = arith.constant 0.000000e+00 : f32
    %94 = vector.shape_cast %93 : vector<1x512xi1> to vector<1x512xi1>
    %95 = vector.broadcast %94 : vector<1x512xi1> to vector<8x512xi1>
    %96 = vector.broadcast %cst_36 : f32 to vector<8x512xf32>
    %97 = arith.select %95, %88, %96 : vector<8x512xi1>, vector<8x512xf32>
    %98 = tpu.concatenate %39, %46, %56, %63, %27, %70, %80, %87, %97 in 0 : vector<8x512xf32>, vector<8x512xf32>, vector<8x512xf32>, vector<8x512xf32>, vector<8x512xf32>, vector<8x512xf32>, vector<8x512xf32>, vector<8x512xf32>, vector<8x512xf32> -> vector<72x512xf32>
    %cst_37 = arith.constant dense<0.000000e+00> : vector<8x512xf32>
    %99 = tpu.matmul %1, %98, %cst_37 {dimension_numbers = #tpu.dot_dimension_numbers<[1], [0], [0], [1], [0, 0, 1, 1], [], []>} : vector<8x72xf32>, vector<72x512xf32>, vector<8x512xf32> -> vector<8x512xf32>
    %100 = vector.broadcast %6 : vector<8x1xf32> to vector<8x512xf32>
    %101 = arith.addf %99, %100 : vector<8x512xf32>
    %cst_38 = arith.constant 0.000000e+00 : f32
    %102 = vector.broadcast %cst_38 : f32 to vector<8x512xf32>
    %103 = arith.cmpf ogt, %101, %102 : vector<8x512xf32>
    %104 = math.exp %101 : vector<8x512xf32>
    %cst_39 = arith.constant 1.000000e+00 : f32
    %105 = vector.broadcast %cst_39 : f32 to vector<8x512xf32>
    %106 = arith.subf %104, %105 : vector<8x512xf32>
    %107 = arith.select %103, %101, %106 : vector<8x512xi1>, vector<8x512xf32>
    %108 = tpu.concatenate %107, %18 in 0 : vector<8x512xf32>, vector<8x512xf32> -> vector<16x512xf32>
    %cst_40 = arith.constant dense<0.000000e+00> : vector<8x512xf32>
    %109 = tpu.matmul %2, %108, %cst_40 {dimension_numbers = #tpu.dot_dimension_numbers<[1], [0], [0], [1], [0, 0, 1, 1], [], []>} : vector<8x16xf32>, vector<16x512xf32>, vector<8x512xf32> -> vector<8x512xf32>
    %110 = vector.broadcast %7 : vector<8x1xf32> to vector<8x512xf32>
    %111 = arith.addf %109, %110 : vector<8x512xf32>
    %c0_41 = arith.constant 0 : index
    %c0_42 = arith.constant 0 : index
    %112 = vector.load %arg4[%c0_41, %c0_42] : memref<8x512xf32, #tpu.memory_space<vmem>>, vector<8x512xf32>
    tpu.vector_store %arg4[%c0_41, %c0_42], %111 {strides = array<i32>} : memref<8x512xf32, #tpu.memory_space<vmem>>, vector<8x512xf32>,
    return
  }
  func.func @transform_0(%arg0: i32) -> (i32, i32) {
    %c0_i32 = arith.constant 0 : i32
    %c0_i32_0 = arith.constant 0 : i32
    return %c0_i32, %arg0 : i32, i32
  }
  func.func @transform_1(%arg0: i32) -> (i32, i32) {
    %c0_i32 = arith.constant 0 : i32
    %c0_i32_0 = arith.constant 0 : i32
    %c0_i32_1 = arith.constant 0 : i32
    return %c0_i32, %c0_i32_0 : i32, i32
  }
  func.func @transform_2(%arg0: i32) -> (i32, i32) {
    %c0_i32 = arith.constant 0 : i32
    %c0_i32_0 = arith.constant 0 : i32
    %c0_i32_1 = arith.constant 0 : i32
    return %c0_i32, %c0_i32_0 : i32, i32
  }
  func.func @transform_3(%arg0: i32) -> (i32, i32) {
    %c0_i32 = arith.constant 0 : i32
    %c0_i32_0 = arith.constant 0 : i32
    return %c0_i32, %arg0 : i32, i32
  }
}

</mosaic_0001>

<bundles_post_ra>
// kernel: tpu_custom_call.1
= control target key start
LH: loop header
LB: loop body
LE: loop exit
PB: predicated region body
PF: predicated region fallthrough
CT: control target
= control target key end

     0   :  { %8 = vsyncpa [#allocation3], 0  ;;  %s1234_s0 = inlined_call_operand.hbm [shape: f32[8,512], index: 0, kind: input, shape index: {}]   ;;  %s1235_s1 = inlined_call_operand.hbm [shape: f32[64,72], index: 1, kind: input, shape index: {}]   ;;  %s1236_s2 = inlined_call_operand.hbm [shape: f32[2,512], index: 2, kind: input, shape index: {}]   ;;  %s1237_s3 = inlined_call_operand.hbm [shape: f32[8,512], index: 3, kind: output, shape index: {}]  }
   0x1   :  { %9 = vsyncpa [#allocation6], 0  ;;  %s26_s14 = sshll.u32 %s1235_s1, 4  ;;  %s27_s14 = int_to_ptr.hbm [resolvable:$true] %s26_s14 }
   0x2   :  { %10 = vsyncpa [#allocation4], 0  ;;  %s858_s15 = smov [#allocation5]   ;;  %s16_s19 = sshll.u32 %s1234_s0, 4  ;;  %s17_s19 = int_to_ptr.hbm [resolvable:$true] %s16_s19 }
   0x3   :  { %s28_s16 = sshll.u32 %s858_s15, 4  ;;  %s859_s20 = smov 128   ;;  %s29_s16 = int_to_ptr.vmem [resolvable:$true] %s28_s16 }
   0x4   :  { %s860_s21 = smov 8   ;;  %s861_s22 = smov [#allocation2]  }
   0x5   :  { %34 = dma.hbm_to_vmem [thread:$0]  %s27_s14, 1024, %s29_s16, [#allocation6], %s859_s20, %s859_s20, %s860_s21  }
   0x6   :  { %s18_s23 = sshll.u32 %s861_s22, 4  ;;  %s40_s26 = sshll.u32 %s1236_s2, 4  ;;  %s19_s23 = int_to_ptr.vmem [resolvable:$true] %s18_s23  ;;  %s41_s26 = int_to_ptr.hbm [resolvable:$true] %s40_s26 }
   0x7   :  { %21 = dma.hbm_to_vmem [thread:$0]  %s17_s19, 512, %s19_s23, [#allocation3]  }
   0x8   :  { %s862_s1 = smov [#allocation7]  }
   0x9   :  { %s42_s27 = sshll.u32 %s862_s1, 4  ;;  %s43_s27 = int_to_ptr.vmem [resolvable:$true] %s42_s27 }
   0xa   :  { %45 = dma.hbm_to_vmem [thread:$0]  %s41_s26, 128, %s43_s27, [#allocation6]  }
   0xb   :  { %852 = dma.done.wait [#allocation3], 512  }
   0xc   :  { %853 = vsyncadd [#allocation3], 4294966784 }
   0xd   :  { %854 = dma.done.wait [#allocation6], 1152  }
   0xe   :  { %855 = vsyncadd [#allocation6], 4294966144  ;;  %v863_v0 = vmov 0   ;;  %v905_v1 = vld [vmem:[#allocation2] sm:$0xff]  ;;  %v907_v2 = vld [vmem:[#allocation2 + $0x8] sm:$0xff]  ;;  %vm113_vm0 = vcmask 64512   ;;  %v228_v49 = vlaneseq }
   0xf   :  { %729 = vset.pattern.permute.xlu0 %v863_v0  ;;  %730 = vset.pattern.permute.xlu1 %v863_v0  ;;  %v909_v3 = vld [vmem:[#allocation2 + $0x10] sm:$0xff]  ;;  %v913_v4 = vld [vmem:[#allocation2 + $0x18] sm:$0xff]  ;;  %v58_v5 = vld [vmem:[#allocation5] sm:$0xff]  ;;  %s864_s0 = smov 113   ;;  %s865_s2 = smov 112  }
  0x10   :  { %731 = vset.pattern.permute.xlu2 %v863_v0  ;;  %132 = vmatpush.msra.mxu0 %v905_v1  ;;  %v63_v6 = vld [vmem:[#allocation5 + $0x28] sm:$0xff]  ;;  %s866_s28 = smov 111   ;;  %s867_s29 = smov 127   ;;  %v61_v32 = vld [vmem:[#allocation5 + $0x18] sm:$0xff]  ;;  %v62_v33 = vld [vmem:[#allocation5 + $0x20] sm:$0xff]  ;;  %v1017_v54 = vand.u32 127, %v228_v49 }
  0x11   :  { %152 = vmatpush.msra.mxu1 %v907_v2  ;;  %172 = vmatpush.msra.mxu2 %v909_v3  ;;  %s868_s30 = smov 16   ;;  %s869_s4 = smov 17   ;;  %v65_v34 = vld [vmem:[#allocation5 + $0x38] sm:$0xff]  ;;  %v993_v43 = vld [vmem:[#allocation7] ss:$2 sm:$0xf] }
  0x12   :  { %192 = vmatpush.msra.mxu3 %v913_v4  ;;  %662 = vmatmul.msk.f32.vlgmr.msra.gmra.mxu0 %vm113_vm0, %v58_v5  ;;  %s870_s5 = smov 1   ;;  %s871_s6 = smov 15   ;;  %v995_v44 = vld [vmem:[#allocation7 + $0x1] ss:$2 sm:$0xf]  ;;  %vm370_vm6 = vcmp.le.f32.partialorder %v993_v43, 14.0 }
  0x13   :  { %663 = vmatmul.msk.f32.vlgmr.msra.gmra.mxu1 %vm113_vm0, %v58_v5  ;;  %664 = vmatmul.msk.f32.vlgmr.msra.gmra.mxu2 %vm113_vm0, %v58_v5  ;;  %vm290_vm5 = vcmp.le.f32.partialorder %v995_v44, 14.0  ;;  %v398_v52 = vsel %vm370_vm6, 1, %v863_v0  ;;  %vm419_vm8 = vcmp.lt.s32.totalorder %v1017_v54, 111  ;;  %vm393_vm10 = vcmp.lt.s32.totalorder %v1017_v54, 112  ;;  %s872_s7 = smov [#allocation8]   ;;  %s647_s11 = sshll.u32 %s1237_s3, 4  ;;  %s648_s11 = int_to_ptr.hbm [resolvable:$true] %s647_s11 }
  0x14   :  { %665 = vmatmul.msk.f32.vlgmr.msra.gmra.mxu3 %vm113_vm0, %v58_v5  ;;  %110 = vperm.xlu0 %729, %v63_v6   ;;  %vm424_vm7 = vmand %vm370_vm6, %vm290_vm5  ;;  %v399_v55 = vperm.slane %v398_v52, 0  ;;  %v400_v62 = vperm.slane %v398_v52, 1  ;;  %vm236_vm12 = vcmp.ge.f32.partialorder %v995_v44, 1.0  ;;  %vm235_vm0 = vcmp.ge.f32.partialorder %v993_v43, 1.0  ;;  %s645_s8 = sshll.u32 %s872_s7, 4  ;;  %s646_s8 = int_to_ptr.vmem [resolvable:$true] %s645_s8 }
  0x15   :  { %v425_v50 = vsel %vm424_vm7, 1, %v863_v0  ;;  %vm371_vm15 = vmand %vm370_vm6, %vm236_vm12 }
  0x16   :  { %v426_v53 = vperm.slane %v425_v50, 0  ;;  %vm403_vm11 = vcmp.eq.s32.totalorder %v399_v55, 1  ;;  %v427_v61 = vperm.slane %v425_v50, 1  ;;  %vm404_vm14 = vcmp.eq.s32.totalorder %v400_v62, 1 }
  0x18   :  { %vm430_vm9 = vcmp.eq.s32.totalorder %v426_v53, 1  ;;  %vm431_vm13 = vcmp.eq.s32.totalorder %v427_v61, 1 }
  0x86   :  { %v111_v7 = vpop.permute.xlu0 %110 }
  0x8f   :  { %v134_v8 = vpop.f32.mrf.mxu0 }
  0x90   :  { %v154_v9 = vpop.f32.mrf.mxu1  ;;  %v135_v10 = vadd.f32 %v134_v8, %v111_v7 }
  0x91   :  { %v155_v11 = vadd.f32 %v154_v9, %v111_v7  ;;  %v428_v9 = vperm.slane %v425_v50, 2 }
  0x92   :  { %v201_v12 = vmul.f32 1.442695, %v135_v10  ;;  %vm197_vm1 = vcmp.gt.f32.partialorder %v135_v10, 0.0 }
  0x93   :  { %v203_v13 = vmul.f32 1.442695, %v155_v11  ;;  %vm198_vm2 = vcmp.gt.f32.partialorder %v155_v11, 0.0 }
  0x94   :  { %732 = vpow2.f32 %v201_v12  ;;  %v401_v12 = vperm.slane %v398_v52, 2 }
  0x95   :  { %734 = vpow2.f32 %v203_v13  ;;  %v402_v13 = vperm.slane %v398_v52, 3 }
  0x96   :  { %v174_v19 = vpop.f32.mrf.mxu2 }
  0x97   :  { %v194_v14 = vpop.f32.mrf.mxu3  ;;  %v175_v22 = vadd.f32 %v174_v19, %v111_v7  ;;  %vm406_vm6 = vcmp.eq.s32.totalorder %v402_v13, 1 }
  0x98   :  { %v195_v15 = vadd.f32 %v194_v14, %v111_v7  ;;  %v1050_v14 = vsel %vm290_vm5, 1, %v863_v0 }
  0x99   :  { %v205_v24 = vmul.f32 1.442695, %v175_v22  ;;  %vm199_vm4 = vcmp.gt.f32.partialorder %v175_v22, 0.0  ;;  %v347_v19 = vperm.slane %v1050_v14, 2 }
  0x9a   :  { %v733_v16 = vpop.eup %732  ;;  %v207_v20 = vmul.f32 1.442695, %v195_v15  ;;  %vm200_vm3 = vcmp.gt.f32.partialorder %v195_v15, 0.0 }
  0x9b   :  { %v666_v17 = vadd.f32 -1.0, %v733_v16  ;;  %v735_v21 = vpop.eup %734 }
  0x9c   :  { %v667_v23 = vadd.f32 -1.0, %v735_v21  ;;  %736 = vpow2.f32 %v207_v20  ;;  %v348_v20 = vperm.slane %v1050_v14, 3 }
  0x9d   :  { %v917_v18 = vsel %vm197_vm1, %v135_v10, %v666_v17  ;;  %738 = vpow2.f32 %v205_v24  ;;  %v429_v10 = vperm.slane %v425_v50, 3  ;;  %vm432_vm1 = vcmp.eq.s32.totalorder %v428_v9, 1 }
  0x9e   :  { %357 = vrot.lane.b32.xlu1 %v917_v18, %s864_s0  ;;  %385 = vrot.lane.b32.xlu2 %v917_v18, %s865_s2  ;;  %v925_v25 = vsel %vm198_vm2, %v155_v11, %v667_v23  ;;  %v1045_v11 = vsel %vm371_vm15, 1, %v863_v0 }
  0x9f   :  { %411 = vrot.lane.b32.xlu0 %v917_v18, %s866_s28  ;;  %vm433_vm2 = vcmp.eq.s32.totalorder %v429_v10, 1  ;;  %v376_v16 = vperm.slane %v1045_v11, 3 }
  0xa2   :  { %v737_v26 = vpop.eup %736 }
  0xa3   :  { %v669_v27 = vadd.f32 -1.0, %v737_v26  ;;  %v739_v28 = vpop.eup %738 }
  0xa4   :  { %v668_v30 = vadd.f32 -1.0, %v739_v28 }
  0xa5   :  { %v933_v29 = vsel %vm200_vm3, %v195_v15, %v669_v27  ;;  %v375_v15 = vperm.slane %v1045_v11, 2  ;;  %vm291_vm3 = vmand %vm235_vm0, %vm290_vm5  ;;  %vm365_vm5 = vcmp.lt.s32.totalorder %v1017_v54, 113  ;;  %v1075_v27 = vsel %vm236_vm12, 1, %v863_v0 }
  0xa6   :  { %331 = vrot.lane.b32.xlu1 %v917_v18, %s867_s29  ;;  %253 = vrot.lane.b32.xlu2 %v925_v25, %s868_s30  ;;  %v940_v31 = vsel %vm199_vm4, %v175_v22, %v668_v30  ;;  %vm405_vm4 = vcmp.eq.s32.totalorder %v401_v12, 1  ;;  %v1082_v30 = vsel %vm291_vm3, 1, %v863_v0  ;;  %vm259_vm3 = vcmp.lt.s32.totalorder %v1017_v54, 16 }
  0xa7   :  { %222 = vrot.lane.b32.xlu0 %v925_v25, %s869_s4  ;;  %vm379_vm7 = vcmp.eq.s32.totalorder %v375_v15, 1  ;;  %v296_v50 = vperm.slane %v1082_v30, 3  ;;  %v345_v15 = vperm.slane %v1050_v14, 0 }
  0xae   :  { %307 = vrot.lane.b32.xlu1 %v925_v25, %s870_s5  ;;  %387 = vrot.lane.b32.xlu2 %v925_v25, %s865_s2 }
  0xaf   :  { %391 = vrot.lane.b32.xlu0 %v933_v29, %s865_s2 }
  0xb6   :  { %279 = vrot.lane.b32.xlu1 %v925_v25, %s871_s6  ;;  %389 = vrot.lane.b32.xlu2 %v940_v31, %s865_s2 }
  0xb7   :  { %363 = vrot.lane.b32.xlu0 %v933_v29, %s864_s0 }
  0xbe   :  { %413 = vrot.lane.b32.xlu1 %v925_v25, %s866_s28  ;;  %361 = vrot.lane.b32.xlu2 %v940_v31, %s864_s0 }
  0xbf   :  { %337 = vrot.lane.b32.xlu0 %v933_v29, %s867_s29 }
  0xc6   :  { %415 = vrot.lane.b32.xlu1 %v940_v31, %s866_s28  ;;  %335 = vrot.lane.b32.xlu2 %v940_v31, %s867_s29 }
  0xc7   :  { %311 = vrot.lane.b32.xlu0 %v933_v29, %s870_s5 }
  0xce   :  { %417 = vrot.lane.b32.xlu1 %v933_v29, %s866_s28  ;;  %309 = vrot.lane.b32.xlu2 %v940_v31, %s870_s5 }
  0xcf   :  { %283 = vrot.lane.b32.xlu0 %v933_v29, %s871_s6 }
  0xd6   :  { %257 = vrot.lane.b32.xlu1 %v933_v29, %s868_s30  ;;  %281 = vrot.lane.b32.xlu2 %v940_v31, %s871_s6 }
  0xd7   :  { %255 = vrot.lane.b32.xlu0 %v940_v31, %s868_s30 }
  0xde   :  { %224 = vrot.lane.b32.xlu1 %v940_v31, %s869_s4  ;;  %226 = vrot.lane.b32.xlu2 %v933_v29, %s869_s4 }
  0xdf   :  { %359 = vrot.lane.b32.xlu0 %v925_v25, %s864_s0 }
  0xe6   :  { %333 = vrot.lane.b32.xlu1 %v925_v25, %s867_s29  ;;  %305 = vrot.lane.b32.xlu2 %v917_v18, %s870_s5 }
  0xe7   :  { %277 = vrot.lane.b32.xlu0 %v917_v18, %s871_s6 }
  0xee   :  { %251 = vrot.lane.b32.xlu1 %v917_v18, %s868_s30  ;;  %220 = vrot.lane.b32.xlu2 %v917_v18, %s869_s4 }
  0xef   :  { %72 = vperm.xlu0 %729, %v61_v32  }
  0xf6   :  { %81 = vperm.xlu1 %730, %v62_v33  }
  0xf7   :  { %549 = vperm.xlu0 %729, %v65_v34  }
  0xf8   :  { %v981_v35 = vpop.permute.xlu2 %385 }
 0x100   :  { %v983_v36 = vpop.permute.xlu2 %253 }
 0x108   :  { %v388_v37 = vpop.permute.xlu2 %387 }
 0x109   :  { %v396_v60 = vsel %vm393_vm10, %v981_v35, %v388_v37 }
 0x110   :  { %v985_v38 = vpop.permute.xlu1 %357  ;;  %v991_v42 = vpop.permute.xlu2 %389 }
 0x111   :  { %v412_v39 = vpop.permute.xlu0 %411  ;;  %v395_v8 = vsel %vm393_vm10, %v388_v37, %v991_v42  ;;  %v321_v37 = vperm.slane %v1075_v27, 2 }
 0x118   :  { %v987_v40 = vpop.permute.xlu1 %331  ;;  %v1003_v47 = vpop.permute.xlu2 %361 }
 0x119   :  { %v989_v41 = vpop.permute.xlu0 %222 }
 0x120   :  { %v997_v45 = vpop.permute.xlu1 %307  ;;  %v1019_v56 = vpop.permute.xlu2 %335 }
 0x121   :  { %v999_v46 = vpop.permute.xlu0 %391 }
 0x122   :  { %v394_v26 = vsel %vm393_vm10, %v991_v42, %v999_v46  ;;  %v397_v28 = vsel %vm393_vm10, %v999_v46, %v981_v35  ;;  %vm237_vm10 = vmand %vm235_vm0, %vm236_vm12  ;;  %v295_v42 = vperm.slane %v1082_v30, 2  ;;  %v1111_v46 = vsel %vm235_vm0, 1, %v863_v0 }
 0x123   :  { %vm313_vm12 = vcmp.lt.s32.totalorder %v1017_v54, 1  ;;  %v1130_v43 = vsel %vm237_vm10, 1, %v863_v0  ;;  %v267_v53 = vperm.slane %v1111_v46, 2  ;;  %v268_v55 = vperm.slane %v1111_v46, 3 }
 0x124   :  { %vm285_vm0 = vcmp.lt.s32.totalorder %v1017_v54, 15  ;;  %vm230_vm10 = vcmp.lt.s32.totalorder %v1017_v54, 17  ;;  %v240_v32 = vperm.slane %v1130_v43, 1 }
 0x128   :  { %v1009_v48 = vpop.permute.xlu1 %279  ;;  %v1031_v63 = vpop.permute.xlu2 %309 }
 0x129   :  { %v1012_v51 = vpop.permute.xlu0 %363 }
 0x12a   :  { %v366_v34 = vsel %vm365_vm5, %v1003_v47, %v1012_v51  ;;  %v369_v35 = vsel %vm365_vm5, %v1012_v51, %v985_v38 }
 0x130   :  { %v414_v57 = vpop.permute.xlu1 %413  ;;  %v282_v24 = vpop.permute.xlu2 %281 }
 0x131   :  { %v1023_v58 = vpop.permute.xlu0 %337  ;;  %v422_v59 = vsel %vm419_vm8, %v412_v39, %v414_v57  ;;  %v287_v61 = vsel %vm285_vm0, %v1009_v48, %v282_v24 }
 0x132   :  { %670 = vmatpush.msk.msrb.mxu0 %vm430_vm9, %v422_v59  ;;  %vm339_vm9 = vcmp.lt.s32.totalorder %v1017_v54, 127 }
 0x133   :  { %v340_v49 = vsel %vm339_vm9, %v1019_v56, %v1023_v58  ;;  %v343_v44 = vsel %vm339_vm9, %v1023_v58, %v987_v40  ;;  %v241_v58 = vperm.slane %v1130_v43, 2 }
 0x134   :  { %671 = vmatpush.msk.msrb.mxu0 %vm403_vm11, %v396_v60  ;;  %vm1085_vm11 = vcmp.eq.s32.totalorder %v347_v19, 1  ;;  %v374_v60 = vperm.slane %v1045_v11, 1  ;;  %v320_v19 = vperm.slane %v1075_v27, 1 }
 0x138   :  { %v416_v5 = vpop.permute.xlu1 %415  ;;  %v1147_v59 = vpop.permute.xlu2 %226 }
 0x139   :  { %v1033_v6 = vpop.permute.xlu0 %311  ;;  %v421_v7 = vsel %vm419_vm8, %v414_v57, %v416_v5  ;;  %v315_v57 = vsel %vm313_vm12, %v997_v45, %v1031_v63 }
 0x13a   :  { %679 = vmatpush.msk.msrb.mxu1 %vm431_vm13, %v421_v7  ;;  %vm1089_vm13 = vcmp.eq.s32.totalorder %v348_v20, 1  ;;  %v314_v0 = vsel %vm313_vm12, %v1031_v63, %v1033_v6 }
 0x13c   :  { %680 = vmatpush.msk.msrb.mxu1 %vm404_vm14, %v395_v8  ;;  %vm325_vm14 = vcmp.eq.s32.totalorder %v321_v37, 1 }
 0x140   :  { %v418_v17 = vpop.permute.xlu1 %417 }
 0x141   :  { %v1061_v21 = vpop.permute.xlu0 %283  ;;  %v420_v22 = vsel %vm419_vm8, %v416_v5, %v418_v17  ;;  %v423_v23 = vsel %vm419_vm8, %v418_v17, %v412_v39  ;;  %vm380_vm8 = vcmp.eq.s32.totalorder %v376_v16, 1  ;;  %v322_v39 = vperm.slane %v1075_v27, 3  ;;  %v306_v17 = vpop.permute.xlu2 %305 }
 0x142   :  { %688 = vmatpush.msk.msrb.mxu2 %vm432_vm1, %v420_v22  ;;  %697 = vmatpush.msk.msrb.mxu3 %vm433_vm2, %v423_v23  ;;  %vm299_vm1 = vcmp.eq.s32.totalorder %v295_v42, 1  ;;  %vm300_vm2 = vcmp.eq.s32.totalorder %v296_v50, 1  ;;  %v286_v62 = vsel %vm285_vm0, %v282_v24, %v1061_v21  ;;  %v346_v16 = vperm.slane %v1050_v14, 1 }
 0x143   :  { %vm326_vm15 = vcmp.eq.s32.totalorder %v322_v39, 1  ;;  %v293_v22 = vperm.slane %v1082_v30, 0  ;;  %v294_v23 = vperm.slane %v1082_v30, 1  ;;  %v239_v30 = vperm.slane %v1130_v43, 0 }
 0x144   :  { %689 = vmatpush.msk.msrb.mxu2 %vm405_vm4, %v394_v26  ;;  %698 = vmatpush.msk.msrb.mxu3 %vm406_vm6, %v397_v28  ;;  %vm271_vm4 = vcmp.eq.s32.totalorder %v267_v53, 1  ;;  %vm272_vm6 = vcmp.eq.s32.totalorder %v268_v55, 1  ;;  %v64_v26 = vld [vmem:[#allocation5 + $0x30] sm:$0xff]  ;;  %v266_v28 = vperm.slane %v1111_v46, 1 }
 0x145   :  { %440 = vperm.xlu2 %731, %v64_v26  }
 0x146   :  { %690 = vmatpush.msk.msrb.mxu2 %vm379_vm7, %v366_v34  ;;  %699 = vmatpush.msk.msrb.mxu3 %vm380_vm8, %v369_v35  ;;  %vm245_vm7 = vcmp.eq.s32.totalorder %v241_v58, 1 }
 0x148   :  { %v1123_v51 = vpop.permute.xlu1 %257  ;;  %691 = vmatpush.msk.msrb.mxu2 %vm1085_vm11, %v340_v49  ;;  %700 = vmatpush.msk.msrb.mxu3 %vm1089_vm13, %v343_v44  ;;  %vm378_vm13 = vcmp.eq.s32.totalorder %v374_v60, 1 }
 0x149   :  { %v256_v52 = vpop.permute.xlu0 %255 }
 0x14a   :  { %498 = vmatpush.msrb.mxu2 %v940_v31  ;;  %518 = vmatpush.msrb.mxu3 %v933_v29  ;;  %v242_v31 = vperm.slane %v1130_v43, 3  ;;  %v373_v29 = vperm.slane %v1045_v11, 0  ;;  %v261_v63 = vsel %vm259_vm3, %v983_v36, %v256_v52  ;;  %v260_v5 = vsel %vm259_vm3, %v256_v52, %v1123_v51  ;;  %v59_v11 = vld [vmem:[#allocation5 + $0x8] sm:$0xff] }
 0x14c   :  { %692 = vmatpush.msk.msrb.mxu2 %vm325_vm14, %v315_v57  ;;  %701 = vmatpush.msk.msrb.mxu3 %vm326_vm15, %v314_v0  ;;  %vm246_vm8 = vcmp.eq.s32.totalorder %v242_v31, 1  ;;  %vm377_vm11 = vcmp.eq.s32.totalorder %v373_v29, 1  ;;  %vm443_vm14 = vcmask 588800   ;;  %vm349_vm15 = vcmp.eq.s32.totalorder %v345_v15, 1 }
 0x14e   :  { %693 = vmatpush.msk.msrb.mxu2 %vm299_vm1, %v287_v61  ;;  %702 = vmatpush.msk.msrb.mxu3 %vm300_vm2, %v286_v62  ;;  %vm350_vm1 = vcmp.eq.s32.totalorder %v346_v16, 1  ;;  %vm324_vm2 = vcmp.eq.s32.totalorder %v320_v19, 1 }
 0x150   :  { %v225_v7 = vpop.permute.xlu1 %224  ;;  %694 = vmatpush.msk.msrb.mxu2 %vm271_vm4, %v261_v63  ;;  %703 = vmatpush.msk.msrb.mxu3 %vm272_vm6, %v260_v5  ;;  %vm298_vm4 = vcmp.eq.s32.totalorder %v294_v23, 1 }
 0x151   :  { %v360_v8 = vpop.permute.xlu0 %359  ;;  %v232_v9 = vsel %vm230_vm10, %v989_v41, %v225_v7  ;;  %v231_v10 = vsel %vm230_vm10, %v225_v7, %v1147_v59 }
 0x152   :  { %v368_v12 = vsel %vm365_vm5, %v985_v38, %v360_v8  ;;  %v367_v13 = vsel %vm365_vm5, %v360_v8, %v1003_v47  ;;  %695 = vmatpush.msk.msrb.mxu2 %vm245_vm7, %v232_v9  ;;  %704 = vmatpush.msk.msrb.mxu3 %vm246_vm8, %v231_v10  ;;  %v319_v38 = vperm.slane %v1075_v27, 0  ;;  %v265_v27 = vperm.slane %v1111_v46, 0 }
 0x153   :  { %672 = vmatpush.msk.msrb.mxu0 %vm377_vm11, %v368_v12  ;;  %681 = vmatpush.msk.msrb.mxu1 %vm378_vm13, %v367_v13  ;;  %vm270_vm7 = vcmp.eq.s32.totalorder %v266_v28, 1  ;;  %vm244_vm8 = vcmp.eq.s32.totalorder %v240_v32, 1 }
 0x154   :  { %696 = vmatmul.msk.f32.vlgmr.msrb.gmra.mxu2 %vm443_vm14, %v59_v11  ;;  %705 = vmatmul.msk.f32.vlgmr.msrb.gmra.mxu3 %vm443_vm14, %v59_v11  ;;  %vm323_vm5 = vcmp.eq.s32.totalorder %v319_v38, 1  ;;  %vm269_vm6 = vcmp.eq.s32.totalorder %v265_v27, 1  ;;  %v60_v38 = vld [vmem:[#allocation5 + $0x10] sm:$0xff] }
 0x158   :  { %v334_v47 = vpop.permute.xlu1 %333 }
 0x159   :  { %v342_v20 = vsel %vm339_vm9, %v987_v40, %v334_v47  ;;  %v341_v14 = vsel %vm339_vm9, %v334_v47, %v1019_v56  ;;  %v278_v24 = vpop.permute.xlu0 %277  ;;  %v317_v40 = vsel %vm313_vm12, %v1033_v6, %v306_v17  ;;  %v316_v56 = vsel %vm313_vm12, %v306_v17, %v997_v45  ;;  %v221_v6 = vpop.permute.xlu2 %220 }
 0x15a   :  { %673 = vmatpush.msk.msrb.mxu0 %vm349_vm15, %v342_v20  ;;  %682 = vmatpush.msk.msrb.mxu1 %vm350_vm1, %v341_v14  ;;  %vm297_vm9 = vcmp.eq.s32.totalorder %v293_v22, 1  ;;  %vm243_vm12 = vcmp.eq.s32.totalorder %v239_v30, 1 }
 0x15c   :  { %458 = vmatpush.msrb.mxu0 %v917_v18  ;;  %478 = vmatpush.msrb.mxu1 %v925_v25  ;;  %v289_v18 = vsel %vm285_vm0, %v1061_v21, %v278_v24  ;;  %v288_v25 = vsel %vm285_vm0, %v278_v24, %v1009_v48  ;;  %v234_v48 = vsel %vm230_vm10, %v1147_v59, %v221_v6 }
 0x15d   :  { %v233_v21 = vsel %vm230_vm10, %v221_v6, %v989_v41 }
 0x15e   :  { %674 = vmatpush.msk.msrb.mxu0 %vm323_vm5, %v317_v40  ;;  %683 = vmatpush.msk.msrb.mxu1 %vm324_vm2, %v316_v56 }
 0x160   :  { %v252_v45 = vpop.permute.xlu1 %251  ;;  %675 = vmatpush.msk.msrb.mxu0 %vm297_vm9, %v289_v18  ;;  %684 = vmatpush.msk.msrb.mxu1 %vm298_vm4, %v288_v25 }
 0x161   :  { %v263_v33 = vsel %vm259_vm3, %v1123_v51, %v252_v45  ;;  %v262_v34 = vsel %vm259_vm3, %v252_v45, %v983_v36  ;;  %v73_v35 = vpop.permute.xlu0 %72 }
 0x162   :  { %676 = vmatpush.msk.msrb.mxu0 %vm269_vm6, %v263_v33  ;;  %685 = vmatpush.msk.msrb.mxu1 %vm270_vm7, %v262_v34  ;;  %v75_v36 = vmul.f32 %v73_v35, %v905_v1  ;;  %v76_v37 = vmul.f32 %v73_v35, %v907_v2  ;;  %v77_v39 = vmul.f32 %v73_v35, %v909_v3 }
 0x163   :  { %v78_v42 = vmul.f32 %v73_v35, %v913_v4 }
 0x164   :  { %677 = vmatpush.msk.msrb.mxu0 %vm243_vm12, %v234_v48  ;;  %686 = vmatpush.msk.msrb.mxu1 %vm244_vm8, %v233_v21 }
 0x165   :  { %678 = vmatmul.msk.f32.vlgmr.msrb.gmra.mxu0 %vm443_vm14, %v59_v11  ;;  %687 = vmatmul.msk.f32.vlgmr.msrb.gmra.mxu1 %vm443_vm14, %v59_v11  ;;  %vm552_vm14 = vcmask 130048  }
 0x168   :  { %v82_v46 = vpop.permute.xlu1 %81 }
 0x169   :  { %v84_v49 = vadd.f32 %v82_v46, %v75_v36  ;;  %v85_v44 = vadd.f32 %v82_v46, %v76_v37  ;;  %v86_v54 = vadd.f32 %v82_v46, %v77_v39  ;;  %v87_v41 = vadd.f32 %v82_v46, %v78_v42  ;;  %v550_v40 = vpop.permute.xlu0 %549 }
 0x16b   :  { %v92_v50 = vmul.f32 1.442695, %v84_v49  ;;  %v94_v51 = vmul.f32 1.442695, %v85_v44  ;;  %v96_v43 = vmul.f32 1.442695, %v86_v54 }
 0x16c   :  { %v98_v52 = vmul.f32 1.442695, %v87_v41  ;;  %vm88_vm0 = vcmp.gt.f32.partialorder %v84_v49, 0.0  ;;  %vm89_vm3 = vcmp.gt.f32.partialorder %v85_v44, 0.0  ;;  %vm90_vm11 = vcmp.gt.f32.partialorder %v86_v54, 0.0 }
 0x16d   :  { %740 = vpow2.f32 %v92_v50  ;;  %vm91_vm13 = vcmp.gt.f32.partialorder %v87_v41, 0.0 }
 0x16e   :  { %742 = vpow2.f32 %v94_v51 }
 0x16f   :  { %744 = vpow2.f32 %v96_v43 }
 0x170   :  { %746 = vpow2.f32 %v98_v52 }
 0x173   :  { %v741_v1 = vpop.eup %740 }
 0x174   :  { %v743_v53 = vpop.eup %742  ;;  %v658_v2 = vadd.f32 -1.0, %v741_v1 }
 0x175   :  { %v745_v55 = vpop.eup %744  ;;  %v659_v3 = vadd.f32 -1.0, %v743_v53 }
 0x176   :  { %v747_v4 = vpop.eup %746  ;;  %v104_v57 = vsel %vm88_vm0, %v84_v49, %v658_v2  ;;  %v660_v0 = vadd.f32 -1.0, %v745_v55 }
 0x177   :  { %570 = vmatpush.msra.mxu0 %v104_v57  ;;  %v105_v58 = vsel %vm89_vm3, %v85_v44, %v659_v3  ;;  %v661_v31 = vadd.f32 -1.0, %v747_v4 }
 0x178   :  { %590 = vmatpush.msra.mxu1 %v105_v58  ;;  %v106_v59 = vsel %vm90_vm11, %v86_v54, %v660_v0 }
 0x179   :  { %610 = vmatpush.msra.mxu2 %v106_v59  ;;  %v107_v29 = vsel %vm91_vm13, %v87_v41, %v661_v31 }
 0x17a   :  { %630 = vmatpush.msra.mxu3 %v107_v29 }
 0x19f   :  { %v441_v60 = vpop.permute.xlu2 %440 }
 0x1d7   :  { %v504_v61 = vpop.f32.mrf.mxu2  ;;  %v524_v62 = vpop.f32.mrf.mxu3 }
 0x1d8   :  { %v505_v63 = vadd.f32 %v504_v61, %v441_v60  ;;  %v525_v5 = vadd.f32 %v524_v62, %v441_v60 }
 0x1da   :  { %v535_v7 = vmul.f32 1.442695, %v505_v63  ;;  %v537_v8 = vmul.f32 1.442695, %v525_v5  ;;  %vm529_vm10 = vcmp.gt.f32.partialorder %v505_v63, 0.0  ;;  %vm530_vm15 = vcmp.gt.f32.partialorder %v525_v5, 0.0 }
 0x1dc   :  { %748 = vpow2.f32 %v535_v7 }
 0x1dd   :  { %750 = vpow2.f32 %v537_v8 }
 0x1e2   :  { %v749_v9 = vpop.eup %748  ;;  %v464_v10 = vpop.f32.mrf.mxu0 }
 0x1e3   :  { %v484_v11 = vpop.f32.mrf.mxu1  ;;  %v751_v12 = vpop.eup %750  ;;  %v465_v13 = vadd.f32 %v464_v10, %v441_v60  ;;  %v708_v16 = vadd.f32 -1.0, %v749_v9 }
 0x1e4   :  { %v485_v15 = vadd.f32 %v484_v11, %v441_v60  ;;  %v709_v17 = vadd.f32 -1.0, %v751_v12 }
 0x1e5   :  { %v531_v19 = vmul.f32 1.442695, %v465_v13  ;;  %v545_v20 = vsel %vm529_vm10, %v505_v63, %v708_v16  ;;  %vm527_vm1 = vcmp.gt.f32.partialorder %v465_v13, 0.0 }
 0x1e6   :  { %v533_v47 = vmul.f32 1.442695, %v485_v15  ;;  %611 = vmatpush.msra.mxu2 %v545_v20  ;;  %v546_v14 = vsel %vm530_vm15, %v525_v5, %v709_v17  ;;  %vm528_vm5 = vcmp.gt.f32.partialorder %v485_v15, 0.0 }
 0x1e7   :  { %752 = vpow2.f32 %v531_v19  ;;  %631 = vmatpush.msra.mxu3 %v546_v14  ;;  %712 = vmatmul.msk.f32.vlgmr.msra.gmra.mxu2 %vm552_vm14, %v60_v38 }
 0x1e8   :  { %754 = vpow2.f32 %v533_v47  ;;  %713 = vmatmul.msk.f32.vlgmr.msra.gmra.mxu3 %vm552_vm14, %v60_v38 }
 0x1ed   :  { %v753_v22 = vpop.eup %752 }
 0x1ee   :  { %v755_v23 = vpop.eup %754  ;;  %v706_v24 = vadd.f32 -1.0, %v753_v22 }
 0x1ef   :  { %v707_v26 = vadd.f32 -1.0, %v755_v23 }
 0x1f0   :  { %v543_v27 = vsel %vm527_vm1, %v465_v13, %v706_v24 }
 0x1f1   :  { %571 = vmatpush.msra.mxu0 %v543_v27  ;;  %v544_v28 = vsel %vm528_vm5, %v485_v15, %v707_v26 }
 0x1f2   :  { %591 = vmatpush.msra.mxu1 %v544_v28  ;;  %710 = vmatmul.msk.f32.vlgmr.msra.gmra.mxu0 %vm552_vm14, %v60_v38 }
 0x1f3   :  { %711 = vmatmul.msk.f32.vlgmr.msra.gmra.mxu1 %vm552_vm14, %v60_v38 }
 0x26a   :  { %v613_v56 = vpop.f32.mrf.mxu2 }
 0x26b   :  { %v614_v30 = vadd.f32 %v613_v56, %v550_v40  ;;  %v633_v32 = vpop.f32.mrf.mxu3 }
 0x26c   :  { %v634_v18 = vadd.f32 %v633_v32, %v550_v40 }
 0x26d   :  { %638 = vst [vmem:[#allocation8 + $0x10] sm:$0xff] %v614_v30 }
 0x26e   :  { %639 = vst [vmem:[#allocation8 + $0x18] sm:$0xff] %v634_v18 }
 0x26f   :  { %v573_v25 = vpop.f32.mrf.mxu0 }
 0x270   :  { %v574_v6 = vadd.f32 %v573_v25, %v550_v40  ;;  %v593_v45 = vpop.f32.mrf.mxu1 }
 0x271   :  { %v594_v33 = vadd.f32 %v593_v45, %v550_v40 }
 0x272   :  { %636 = vst [vmem:[#allocation8] sm:$0xff] %v574_v6 }
 0x273   :  { %637 = vst [vmem:[#allocation8 + $0x8] sm:$0xff] %v594_v33 }
 0x274   :  { %650 = dma.vmem_to_hbm [thread:$0]  %s646_s8, 512, %s648_s11, [#allocation4]  }
 0x275   :  { %856 = dma.done.wait [#allocation4], 512  }
 0x276   :  { %857 = vsyncadd [#allocation4], 4294966784 }
 0x277   :  { %655 = vsyncpa [#allocation3], 1 }
 0x278   :  { %656 = vsyncpa [#allocation6], 1 }
 0x279   :  { %657 = vsyncpa [#allocation4], 1 }

</bundles_post_ra>
